<compile_context>
chip_gen: v7x
topology: tpu7x:2x2x1
jax: 0.10.0
libtpu: 0.0.40
codegen_flags: <defaults>
</compile_context>

<pallas_src>
import functools

import jax
import jax.numpy as jnp
from jax.experimental import pallas as pl
from jax.experimental.pallas import tpu as pltpu

LANES = 128                     # lane dim of the flattened slab
MAX_BLOCK_ROWS = 4096           # (4096, 128) f32 = 2 MiB per input block
VMEM_LIMIT_BYTES = 32 * 1024 * 1024


def _focal_elementwise(x, t, *, gamma, alpha, logits):
    """Per-element focal loss, computed in f32 regardless of input dtype."""
    x = x.astype(jnp.float32)
    t = t.astype(jnp.float32)
    if logits:
        # Numerically-stable BCE-with-logits (== F.binary_cross_entropy_with_logits):
        #   bce = max(x, 0) - x*t + log1p(exp(-|x|))
        bce = jnp.maximum(x, 0.0) - x * t + jnp.log1p(jnp.exp(-jnp.abs(x)))
    else:
        # nn.BCELoss: -(t*log(p) + (1-t)*log(1-p)), with logs clamped at -100.
        log_p = jnp.maximum(jnp.log(x), -100.0)
        log_1mp = jnp.maximum(jnp.log1p(-x), -100.0)
        bce = -(t * log_p + (1.0 - t) * log_1mp)

    pt = jnp.exp(-bce)
    q = 1.0 - pt

    # (1 - pt) ** gamma, specialized for small integer gamma (gamma=2 -> q*q).
    g = float(gamma)
    if g == 0.0:
        w = jnp.ones_like(q)
    elif g.is_integer() and 1.0 <= g <= 8.0:
        w = q
        for _ in range(int(g) - 1):
            w = w * q
    else:
        w = jnp.power(q, jnp.float32(g))

    # alpha_t = alpha*t + (1-alpha)*(1-t), folded to 2 ops (no f32 FMA on VPU).
    alpha_t = (2.0 * float(alpha) - 1.0) * t + (1.0 - float(alpha))
    return alpha_t * w * bce


def _block_partial_sum(contrib, block_rows, lanes):
    """Reduce a (block_rows, lanes) tile to a (1, 1, lanes) partial sum.

    Leading-dim reshape + sum(axis=0) is a pure vreg-add tree (no lane/sublane
    boundary crossing); only the final 8->1 step is a sublane (XLU) reduce.
    """
    if block_rows % 8 == 0 and block_rows >= 8:
        contrib = contrib.reshape(block_rows // 8, 8, lanes).sum(axis=0)
    return jnp.sum(contrib, axis=0, keepdims=True).reshape(1, 1, lanes)


def _focal_sum_kernel(x_ref, t_ref, o_ref, *, gamma, alpha, logits, n_valid,
                      block_rows, lanes, has_tail):
    contrib = _focal_elementwise(
        x_ref[...], t_ref[...], gamma=gamma, alpha=alpha, logits=logits)

    if not has_tail:
        # Every block is fully valid: no masking anywhere.
        o_ref[...] = _block_partial_sum(contrib, block_rows, lanes)
        return

    start_row = pl.program_id(0) * block_rows
    # Only the last block can contain invalid (padded / out-of-bounds) elements.
    is_tail = (start_row + block_rows) * lanes > n_valid

    @pl.when(jnp.logical_not(is_tail))
    def _():
        o_ref[...] = _block_partial_sum(contrib, block_rows, lanes)

    @pl.when(is_tail)
    def _():
        # Flat element index; mask anything >= n_valid (covers both the
        # lane-level pad and the partial-block rows past the array end).
        # NOTE: int32 index math -- fine for inputs below ~2**31 elements.
        row = jax.lax.broadcasted_iota(jnp.int32, (block_rows, lanes), 0) + start_row
        lane = jax.lax.broadcasted_iota(jnp.int32, (block_rows, lanes), 1)
        flat = row * lanes + lane
        masked = jnp.where(flat < n_valid, contrib, 0.0)
        o_ref[...] = _block_partial_sum(masked, block_rows, lanes)


def _focal_map_kernel(x_ref, t_ref, o_ref, *, gamma, alpha, logits):
    o_ref[...] = _focal_elementwise(
        x_ref[...], t_ref[...], gamma=gamma, alpha=alpha, logits=logits
    ).astype(o_ref.dtype)


def focal_loss_pallas(inputs, targets, *, gamma=2.0, alpha=0.5, logits=True,
                      reduction="mean"):
    """FocalLossCustom.forward: reduction in {'mean', 'sum', 'none'}."""
    assert inputs.shape == targets.shape
    assert reduction in ("mean", "sum", "none")
    n_total = int(inputs.size)

    x = inputs.reshape(-1)
    t = targets.reshape(-1)          # pass targets through in their native dtype

    rows = pl.cdiv(n_total, LANES)
    n_lane = rows * LANES
    if n_lane != n_total:
        # Rare ragged-lane case: pad < LANES elements so the 2-D reshape is
        # possible; padded elements are masked inside the kernel, so the pad
        # value is irrelevant.
        x = jnp.pad(x, (0, n_lane - n_total))
        t = jnp.pad(t, (0, n_lane - n_total))
    x2 = x.reshape(rows, LANES)
    t2 = t.reshape(rows, LANES)

    # Full-dim block for small inputs (legal for any dtype); otherwise a
    # 4096-row block (multiple of 32 -> satisfies f32/bf16/int8/bool tiling).
    block_rows = rows if rows <= MAX_BLOCK_ROWS else MAX_BLOCK_ROWS
    num_blocks = pl.cdiv(rows, block_rows)

    in_specs = [
        pl.BlockSpec((block_rows, LANES), lambda i: (i, 0)),
        pl.BlockSpec((block_rows, LANES), lambda i: (i, 0)),
    ]
    cparams = pltpu.CompilerParams(
        dimension_semantics=("parallel",),          # shards across TCs on v7x
        vmem_limit_bytes=VMEM_LIMIT_BYTES,
    )

    if reduction == "none":
        out = pl.pallas_call(
            functools.partial(_focal_map_kernel, gamma=float(gamma),
                              alpha=float(alpha), logits=bool(logits)),
            out_shape=jax.ShapeDtypeStruct((rows, LANES), jnp.float32),
            grid=(num_blocks,),
            in_specs=in_specs,
            out_specs=pl.BlockSpec((block_rows, LANES), lambda i: (i, 0)),
            compiler_params=cparams,
        )(x2, t2)
        flat = out.reshape(-1)
        if n_lane != n_total:
            flat = flat[:n_total]
        return flat.reshape(inputs.shape)

    has_tail = (num_blocks * block_rows * LANES) != n_total
    partials = pl.pallas_call(
        functools.partial(_focal_sum_kernel, gamma=float(gamma),
                          alpha=float(alpha), logits=bool(logits),
                          n_valid=n_total, block_rows=block_rows,
                          lanes=LANES, has_tail=has_tail),
        out_shape=jax.ShapeDtypeStruct((num_blocks, 1, LANES), jnp.float32),
        grid=(num_blocks,),
        in_specs=in_specs,
        out_specs=pl.BlockSpec((1, 1, LANES), lambda i: (i, 0, 0)),
        compiler_params=cparams,
    )(x2, t2)

    total = jnp.sum(partials)
    if reduction == "sum":
        return total
    return total / jnp.float32(n_total)


# ----------------------------- pure-JAX reference -----------------------------

def _focal_ref_elementwise(x, t, gamma, alpha):
    x = x.astype(jnp.float32)
    t = t.astype(jnp.float32)
    bce = jnp.maximum(x, 0.0) - x * t + jnp.log1p(jnp.exp(-jnp.abs(x)))
    pt = jnp.exp(-bce)
    alpha_t = alpha * t + (1.0 - alpha) * (1.0 - t)
    return alpha_t * jnp.power(1.0 - pt, gamma) * bce


def focal_loss_ref(x, t, gamma=2.0, alpha=0.5):
    return jnp.mean(_focal_ref_elementwise(x, t, gamma, alpha))


if __name__ == "__main__":
    key = jax.random.PRNGKey(0)
    k1, k2, k3, k4 = jax.random.split(key, 4)

    # Small shape consistent with (batch_size, ...): (2, 4, 16, 16).
    inputs = jax.random.normal(k1, (2, 4, 16, 16), dtype=jnp.float32)
    targets = jax.random.bernoulli(k2, 0.3, (2, 4, 16, 16)).astype(jnp.float32)

    loss = jax.block_until_ready(
        focal_loss_pallas(inputs, targets, gamma=2.0, alpha=0.5))
    ref = focal_loss_ref(inputs, targets, gamma=2.0, alpha=0.5)
    assert jnp.allclose(loss, ref, rtol=1e-5, atol=1e-6), (loss, ref)

    # Ragged size (not a multiple of 128): exercises the in-kernel tail mask.
    xr = jax.random.normal(k3, (2, 3, 50), dtype=jnp.float32)
    tr = jax.random.bernoulli(k4, 0.5, (2, 3, 50)).astype(jnp.float32)
    loss_r = jax.block_until_ready(
        focal_loss_pallas(xr, tr, gamma=2.0, alpha=0.5))
    ref_r = focal_loss_ref(xr, tr, gamma=2.0, alpha=0.5)
    assert jnp.allclose(loss_r, ref_r, rtol=1e-5, atol=1e-6), (loss_r, ref_r)

    # reduction='none' path.
    none_out = jax.block_until_ready(
        focal_loss_pallas(inputs, targets, gamma=2.0, alpha=0.5, reduction="none"))
    ref_none = _focal_ref_elementwise(inputs, targets, 2.0, 0.5)
    assert none_out.shape == inputs.shape
    assert jnp.allclose(none_out, ref_none, rtol=1e-5, atol=1e-6)

    print("KERNEL_OK")
</pallas_src>

<mosaic_0001>
module attributes {stable_mosaic.version = 11 : i64} {
  func.func @_focal_sum_kernel(%arg0: i32, %arg1: memref<16x128xf32, #tpu.memory_space<vmem>>, %arg2: memref<16x128xf32, #tpu.memory_space<vmem>>, %arg3: memref<1x1x128xf32, #tpu.memory_space<vmem>>) attributes {dimension_semantics = [#tpu.dimension_semantics<parallel>], iteration_bounds = array<i64: 1>, scalar_prefetch = 0 : i64, scratch_operands = 0 : i64, tpu.core_type = #tpu.core_type<tc>, window_params = [{transform_indices = @transform_0, window_bounds = array<i64: 16, 128>}, {transform_indices = @transform_1, window_bounds = array<i64: 16, 128>}, {transform_indices = @transform_2, window_bounds = array<i64: 1, 1, 128>}]} {
    %c0 = arith.constant 0 : index
    %c0_0 = arith.constant 0 : index
    %0 = vector.load %arg1[%c0, %c0_0] : memref<16x128xf32, #tpu.memory_space<vmem>>, vector<16x128xf32>
    %c0_1 = arith.constant 0 : index
    %c0_2 = arith.constant 0 : index
    %1 = vector.load %arg2[%c0_1, %c0_2] : memref<16x128xf32, #tpu.memory_space<vmem>>, vector<16x128xf32>
    %cst = arith.constant 0.000000e+00 : f32
    %2 = vector.broadcast %cst : f32 to vector<16x128xf32>
    %3 = arith.maximumf %0, %2 : vector<16x128xf32>
    %4 = arith.mulf %0, %1 : vector<16x128xf32>
    %5 = arith.subf %3, %4 : vector<16x128xf32>
    %6 = math.absf %0 : vector<16x128xf32>
    %cst_3 = arith.constant 0.000000e+00 : f32
    %7 = vector.broadcast %cst_3 : f32 to vector<16x128xf32>
    %8 = arith.subf %7, %6 : vector<16x128xf32>
    %9 = math.exp %8 : vector<16x128xf32>
    %10 = math.log1p %9 : vector<16x128xf32>
    %11 = arith.addf %5, %10 : vector<16x128xf32>
    %cst_4 = arith.constant 0.000000e+00 : f32
    %12 = vector.broadcast %cst_4 : f32 to vector<16x128xf32>
    %13 = arith.subf %12, %11 : vector<16x128xf32>
    %14 = math.exp %13 : vector<16x128xf32>
    %cst_5 = arith.constant 1.000000e+00 : f32
    %15 = vector.broadcast %cst_5 : f32 to vector<16x128xf32>
    %16 = arith.subf %15, %14 : vector<16x128xf32>
    %17 = arith.mulf %16, %16 : vector<16x128xf32>
    %cst_6 = arith.constant 0.000000e+00 : f32
    %18 = vector.broadcast %cst_6 : f32 to vector<16x128xf32>
    %19 = arith.mulf %18, %1 : vector<16x128xf32>
    %cst_7 = arith.constant 5.000000e-01 : f32
    %20 = vector.broadcast %cst_7 : f32 to vector<16x128xf32>
    %21 = arith.addf %19, %20 : vector<16x128xf32>
    %22 = arith.mulf %21, %17 : vector<16x128xf32>
    %23 = arith.mulf %22, %11 : vector<16x128xf32>
    %24 = vector.shape_cast %23 : vector<16x128xf32> to vector<2x8x128xf32>
    %cst_8 = arith.constant dense<0.000000e+00> : vector<8x128xf32>
    %25 = vector.multi_reduction <add>, %24, %cst_8 [0] : vector<2x8x128xf32> to vector<8x128xf32>
    %cst_9 = arith.constant dense<0.000000e+00> : vector<128xf32>
    %26 = vector.multi_reduction <add>, %25, %cst_9 [0] : vector<8x128xf32> to vector<128xf32>
    %27 = vector.shape_cast %26 : vector<128xf32> to vector<1x128xf32>
    %28 = vector.shape_cast %27 : vector<1x128xf32> to vector<1x1x128xf32>
    %c0_10 = arith.constant 0 : index
    %c0_11 = arith.constant 0 : index
    %c0_12 = arith.constant 0 : index
    %29 = vector.load %arg3[%c0_10, %c0_11, %c0_12] : memref<1x1x128xf32, #tpu.memory_space<vmem>>, vector<1x1x128xf32>
    tpu.vector_store %arg3[%c0_10, %c0_11, %c0_12], %28 {strides = array<i32>} : memref<1x1x128xf32, #tpu.memory_space<vmem>>, vector<1x1x128xf32>,
    return
  }
  func.func @transform_0(%arg0: i32) -> (i32, i32) {
    %c0_i32 = arith.constant 0 : i32
    %c0_i32_0 = arith.constant 0 : i32
    return %arg0, %c0_i32 : i32, i32
  }
  func.func @transform_1(%arg0: i32) -> (i32, i32) {
    %c0_i32 = arith.constant 0 : i32
    %c0_i32_0 = arith.constant 0 : i32
    return %arg0, %c0_i32 : i32, i32
  }
  func.func @transform_2(%arg0: i32) -> (i32, i32, i32) {
    %c0_i32 = arith.constant 0 : i32
    %c0_i32_0 = arith.constant 0 : i32
    %c0_i32_1 = arith.constant 0 : i32
    return %arg0, %c0_i32, %c0_i32_0 : i32, i32, i32
  }
}

</mosaic_0001>

<bundles_post_ra>
// kernel: tpu_custom_call.1
= control target key start
LH: loop header
LB: loop body
LE: loop exit
PB: predicated region body
PF: predicated region fallthrough
CT: control target
= control target key end

     0   :  { %7 = vsyncpa [#allocation3], 0  ;;  %s265_s0 = inlined_call_operand.hbm [shape: f32[16,128], index: 0, kind: input, shape index: {}]   ;;  %s266_s1 = inlined_call_operand.hbm [shape: f32[16,128], index: 1, kind: input, shape index: {}]   ;;  %s267_s2 = inlined_call_operand.hbm [shape: f32[1,1,128], index: 2, kind: output, shape index: {}]  }
   0x1   :  { %8 = vsyncpa [#allocation6], 0 }
   0x2   :  { %9 = vsyncpa [#allocation4], 0  ;;  %s209_s9 = smov [#allocation2]   ;;  %s137_s13 = scalar_lea.hbm %s265_s0, 256 }
   0x3   :  { %s15_s10 = sshll.u32 %s209_s9, 4  ;;  %p138_p0 = scmp.ne.s32.totalorder %s265_s0, %s137_s13  ;;  %s16_s10 = int_to_ptr.vmem [resolvable:$true] %s15_s10 }
   0x4   :  { %p141_p1 = scmp.lt.u32.totalorder %s137_s13, %s265_s0 }
   0x6   :  { %p143_p2 = pnand %p141_p1, %p138_p0 }
   0x8   :  { %146 = shalt.err (!%p143_p2)
}
   0x9   :  { %s147_s18 = scalar_lea.vmem %s16_s10, 256  ;;  %p152_p4 = scmp.lt.s32.totalorder %s16_s10, %s16_s10 }
   0xa   :  { %p148_p3 = scmp.ne.s32.totalorder %s16_s10, %s147_s18  ;;  %p153_p5 = scmp.lt.s32.totalorder %s147_s18, %s147_s18 }
   0xc   :  { %p154_p6 = por %p153_p5, %p152_p4 }
   0xe   :  { %p155_p7 = pnand %p154_p6, %p148_p3 }
  0x10   :  { %158 = shalt.err (!%p155_p7)
}
  0x11   :  { %s210_s19 = smov 128   ;;  %s211_s20 = smov 8  }
  0x12   :  { %21 = dma.hbm_to_vmem [thread:$0]  %s265_s0, 256, %s16_s10, [#allocation3], %s210_s19, %s210_s19, %s211_s20  }
  0x13   :  { %s212_s23 = smov [#allocation5]   ;;  %s159_s27 = scalar_lea.hbm %s266_s1, 256 }
  0x14   :  { %s27_s24 = sshll.u32 %s212_s23, 4  ;;  %p160_p8 = scmp.ne.s32.totalorder %s266_s1, %s159_s27  ;;  %s28_s24 = int_to_ptr.vmem [resolvable:$true] %s27_s24 }
  0x15   :  { %p163_p9 = scmp.lt.u32.totalorder %s159_s27, %s266_s1 }
  0x17   :  { %p165_p10 = pnand %p163_p9, %p160_p8 }
  0x19   :  { %168 = shalt.err (!%p165_p10)
}
  0x1a   :  { %s169_s4 = scalar_lea.vmem %s28_s24, 256  ;;  %p174_p12 = scmp.lt.s32.totalorder %s28_s24, %s28_s24 }
  0x1b   :  { %p170_p11 = scmp.ne.s32.totalorder %s28_s24, %s169_s4  ;;  %p175_p13 = scmp.lt.s32.totalorder %s169_s4, %s169_s4 }
  0x1d   :  { %p176_p0 = por %p175_p13, %p174_p12 }
  0x1f   :  { %p177_p1 = pnand %p176_p0, %p170_p11 }
  0x21   :  { %180 = shalt.err (!%p177_p1)
}
  0x22   :  { %33 = dma.hbm_to_vmem [thread:$0]  %s266_s1, 256, %s28_s24, [#allocation6], %s210_s19, %s210_s19, %s211_s20  }
  0x23   :  { %203 = dma.done.wait [#allocation3], 256  }
  0x24   :  { %204 = vsyncadd [#allocation3], 4294967040 }
  0x25   :  { %205 = dma.done.wait [#allocation6], 256  }
  0x26   :  { %206 = vsyncadd [#allocation6], 4294967040  ;;  %v40_v0 = vld [vmem:[#allocation2] sm:$0xff]  ;;  %v41_v1 = vld [vmem:[#allocation2 + $0x8] sm:$0xff]  ;;  %s213_s1 = smov [#allocation7]  }
  0x27   :  { %v50_v2 = vand.u32 2147483647, %v40_v0  ;;  %v51_v3 = vand.u32 2147483647, %v41_v1  ;;  %v42_v14 = vld [vmem:[#allocation5] sm:$0xff]  ;;  %v43_v15 = vld [vmem:[#allocation5 + $0x8] sm:$0xff] }
  0x28   :  { %v44_v17 = vmax.f32 %v40_v0, 0.0  ;;  %v46_v18 = vmul.f32 %v42_v14, %v40_v0  ;;  %v45_v21 = vmax.f32 %v41_v1, 0.0  ;;  %v47_v22 = vmul.f32 %v43_v15, %v41_v1  ;;  %s110_s6 = sshll.u32 %s213_s1, 4  ;;  %s111_s6 = int_to_ptr.vmem [resolvable:$true] %s110_s6 }
  0x29   :  { %v52_v4 = vsub.f32 0.0, %v50_v2  ;;  %v53_v5 = vsub.f32 0.0, %v51_v3  ;;  %v88_v40 = vmul.f32 0.0, %v42_v14  ;;  %v89_v41 = vmul.f32 0.0, %v43_v15  ;;  %s181_s7 = scalar_lea.vmem %s111_s6, 16  ;;  %s185_s8 = scalar_lea.vmem %s111_s6, 32 }
  0x2a   :  { %v48_v26 = vsub.f32 %v44_v17, %v46_v18  ;;  %v49_v29 = vsub.f32 %v45_v21, %v47_v22  ;;  %p182_p2 = scmp.ne.s32.totalorder %s111_s6, %s181_s7  ;;  %p186_p3 = scmp.lt.s32.totalorder %s111_s6, %s111_s6 }
  0x2b   :  { %v54_v6 = vmul.f32 1.442695, %v52_v4  ;;  %v56_v7 = vmul.f32 1.442695, %v53_v5  ;;  %v90_v45 = vadd.f32 0.5, %v88_v40  ;;  %v91_v47 = vadd.f32 0.5, %v89_v41  ;;  %p187_p4 = scmp.lt.s32.totalorder %s185_s8, %s181_s7 }
  0x2d   :  { %125 = vpow2.f32 %v54_v6  ;;  %p188_p5 = por %p187_p4, %p186_p3 }
  0x2e   :  { %127 = vpow2.f32 %v56_v7 }
  0x2f   :  { %p189_p6 = pnand %p188_p5, %p182_p2 }
  0x37   :  { %v126_v8 = vpop.eup %125 }
  0x38   :  { %v128_v9 = vpop.eup %127  ;;  %v58_v10 = vadd.f32 1.0, %v126_v8  ;;  %v61_v12 = vmul.f32 -0.5, %v126_v8  ;;  %v64_v19 = vand.u32 2147483647, %v126_v8 }
  0x39   :  { %v67_v11 = vadd.f32 1.0, %v128_v9  ;;  %v70_v13 = vmul.f32 -0.5, %v128_v9  ;;  %v73_v23 = vand.u32 2147483647, %v128_v9 }
  0x3a   :  { %129 = vlog2.f32 %v58_v10  ;;  %v62_v16 = vadd.f32 1.0, %v61_v12  ;;  %vm65_vm0 = vcmp.lt.f32.partialorder %v64_v19, 0.0004427343 }
  0x3b   :  { %131 = vlog2.f32 %v67_v11  ;;  %v71_v20 = vadd.f32 1.0, %v70_v13  ;;  %vm74_vm1 = vcmp.lt.f32.partialorder %v73_v23, 0.0004427343 }
  0x3c   :  { %v63_v24 = vmul.f32 %v126_v8, %v62_v16 }
  0x3d   :  { %v72_v27 = vmul.f32 %v128_v9, %v71_v20 }
  0x44   :  { %v130_v25 = vpop.eup %129 }
  0x45   :  { %v132_v28 = vpop.eup %131  ;;  %v60_v30 = vmul.f32 0.6931472, %v130_v25 }
  0x46   :  { %v69_v31 = vmul.f32 0.6931472, %v132_v28 }
  0x47   :  { %v66_v32 = vsel %vm65_vm0, %v63_v24, %v60_v30 }
  0x48   :  { %v75_v33 = vsel %vm74_vm1, %v72_v27, %v69_v31  ;;  %v76_v34 = vadd.f32 %v66_v32, %v48_v26 }
  0x49   :  { %v77_v35 = vadd.f32 %v75_v33, %v49_v29 }
  0x4a   :  { %v78_v36 = vsub.f32 0.0, %v76_v34 }
  0x4b   :  { %v79_v37 = vsub.f32 0.0, %v77_v35 }
  0x4c   :  { %v80_v38 = vmul.f32 1.442695, %v78_v36 }
  0x4d   :  { %v82_v39 = vmul.f32 1.442695, %v79_v37 }
  0x4e   :  { %133 = vpow2.f32 %v80_v38 }
  0x4f   :  { %135 = vpow2.f32 %v82_v39 }
  0x58   :  { %v134_v42 = vpop.eup %133 }
  0x59   :  { %v136_v43 = vpop.eup %135  ;;  %v84_v44 = vsub.f32 1.0, %v134_v42 }
  0x5a   :  { %v85_v46 = vsub.f32 1.0, %v136_v43 }
  0x5b   :  { %v86_v48 = vmul.f32 %v84_v44, %v84_v44 }
  0x5c   :  { %v87_v49 = vmul.f32 %v85_v46, %v85_v46 }
  0x5d   :  { %v92_v50 = vmul.f32 %v90_v45, %v86_v48 }
  0x5e   :  { %v93_v51 = vmul.f32 %v91_v47, %v87_v49 }
  0x5f   :  { %v94_v52 = vmul.f32 %v92_v50, %v76_v34 }
  0x60   :  { %v95_v53 = vmul.f32 %v93_v51, %v77_v35 }
  0x62   :  { %v96_v54 = vadd.f32 %v95_v53, %v94_v52 }
  0x64   :  { %v97_v55 = vrot.slane %v96_v54, 4 }
  0x66   :  { %v98_v56 = vadd.f32 %v97_v55, %v96_v54 }
  0x68   :  { %v99_v57 = vrot.slane %v98_v56, 2 }
  0x6a   :  { %v100_v58 = vadd.f32 %v99_v57, %v98_v56 }
  0x6c   :  { %v101_v59 = vrot.slane %v100_v58, 1 }
  0x6e   :  { %v102_v60 = vadd.f32 %v101_v59, %v100_v58 }
  0x70   :  { %103 = vst [vmem:[#allocation7] sm:$0x1] %v102_v60 }
  0x71   :  { %192 = shalt.err (!%p189_p6)
}
  0x72   :  { %s193_s11 = scalar_lea.hbm %s267_s2, 16 }
  0x73   :  { %p194_p7 = scmp.ne.s32.totalorder %s267_s2, %s193_s11  ;;  %p197_p8 = scmp.lt.u32.totalorder %s193_s11, %s267_s2 }
  0x75   :  { %p199_p9 = pnand %p197_p8, %p194_p7 }
  0x77   :  { %202 = shalt.err (!%p199_p9)
}
  0x78   :  { %113 = dma.vmem_to_hbm [thread:$0]  %s111_s6, 16, %s267_s2, [#allocation4]  }
  0x79   :  { %207 = dma.done.wait [#allocation4], 16  }
  0x7a   :  { %208 = vsyncadd [#allocation4], 4294967280 }
  0x7b   :  { %117 = vsyncpa [#allocation3], 1 }
  0x7c   :  { %118 = vsyncpa [#allocation6], 1 }
  0x7d   :  { %119 = vsyncpa [#allocation4], 1 }

</bundles_post_ra>
